<compile_context>
chip_gen: v5e
topology: v5e:2x2
jax: 0.10.0
libtpu: 0.0.40
codegen_flags: <defaults>
</compile_context>

<pallas_src>
import jax
import jax.numpy as jnp
import numpy as np
from jax.experimental import pallas as pl
from jax.experimental.pallas import tpu as pltpu


def _vmem_capacity_bytes():
    try:
        return int(pltpu.get_tpu_info().vmem_capacity_bytes)
    except Exception:
        return 64 * 1024 * 1024  # conservative fallback (v7x per-TC VMEM)


def _select_tiles(rows, cols, elem_bytes):
    """Pick (bn, bd) so each streamed input tile is ~4-8 MiB (VMEM aware)."""
    cap = _vmem_capacity_bytes()
    # 2 streamed inputs x 2 pipeline buffers; keep all tiles within ~45% of VMEM.
    tile_bytes = cap * 45 // 100 // 4
    tile_bytes = max(512 * 1024, min(tile_bytes, 8 * 1024 * 1024))

    row_bytes = cols * elem_bytes
    if row_bytes * 8 > tile_bytes:
        # Very wide feature axis: tile the lane dimension too (2-D reduction grid).
        bd = max(128, (tile_bytes // (8 * elem_bytes)) // 128 * 128)
        bn = 8
    else:
        bd = cols
        bn = max(32, tile_bytes // row_bytes)
        bn -= bn % 32  # sublane multiple for f32 / bf16 / int8 streaming
    # A block equal to the full array dim is always legal, so clamp to extents.
    return min(bn, rows), min(bd, cols), cap


def _make_kernel(rows, cols, bn, bd, half, need_row_mask, need_col_mask):
    def kernel(params_ref, out_ref, tgt_ref, loss_ref):
        c = pl.program_id(0)   # TensorCore split ("parallel")
        i = pl.program_id(1)   # row-block within this core's half
        j = pl.program_id(2)   # lane-block

        weight = params_ref[0]
        inv_n = params_ref[1]
        wd_term = params_ref[2]

        # Initialize this core's resident SMEM accumulator on its first step;
        # the precomputed weight-decay term seeds core 0 only.
        @pl.when((i == 0) & (j == 0))
        def _init():
            loss_ref[0, 0] = jnp.where(c == 0, wd_term, jnp.float32(0.0))

        # Stream in source dtype, upcast per tile (accumulation stays f32).
        o = out_ref[...].astype(jnp.float32)
        t = tgt_ref[...].astype(jnp.float32)
        d = o - t
        # weight*relu(d) + (1-weight)*relu(-d) == relu(d) - (1-weight)*d
        val = jnp.maximum(d, 0.0) - (1.0 - weight) * d

        # Tail masking (emitted at trace time only when the tiling requires it).
        if need_row_mask or need_col_mask:
            mask = None
            if need_row_mask:
                r0 = (c * half + i) * bn
                rid = r0 + jax.lax.broadcasted_iota(jnp.int32, (bn, bd), 0)
                mask = rid < rows
            if need_col_mask:
                cid = j * bd + jax.lax.broadcasted_iota(jnp.int32, (bn, bd), 1)
                cmask = cid < cols
                mask = cmask if mask is None else (mask & cmask)
            val = jnp.where(mask, val, 0.0)

        loss_ref[0, 0] += inv_n * jnp.sum(val)

    return kernel


def weighted_xor_loss(output, target, w, *, weight, weight_decay,
                      block_n=None, block_d=None):
    """Scalar weightedXor loss. output/target: (N, D), w: (H, D)."""
    n, d = output.shape
    assert target.shape == (n, d)
    assert w.shape[1] == d

    # --- weight-decay term: tiny O(H*D), computed once in plain JAX so `w` is
    #     never pulled through (and double-buffered in) the streamed pipeline.
    w_rows = jnp.sum(w.astype(jnp.float32) - jnp.float32(1.0 / d), axis=1)
    w_rows = jnp.maximum(w_rows, 1.0)
    wd_term = jnp.float32(weight_decay) * jnp.sum(w_rows * w_rows)

    # --- lane-dense view of the streamed data (full elementwise reduce, so
    #     element order is irrelevant). Only applied when it needs no padding.
    x, y = output, target
    if d < 128:
        for lane in (1024, 512, 256, 128):
            if (n * d) % lane == 0:
                x = x.reshape(-1, lane)
                y = y.reshape(-1, lane)
                break
    rows, cols = x.shape

    elem_bytes = max(jnp.dtype(x.dtype).itemsize, jnp.dtype(y.dtype).itemsize)
    bn, bd, vmem_cap = _select_tiles(rows, cols, elem_bytes)
    if block_n is not None:
        bn = int(block_n)
    if block_d is not None:
        bd = int(block_d)

    nrb = pl.cdiv(rows, bn)
    ncb = pl.cdiv(cols, bd)
    # Leading "parallel" axis feeds both TensorCores on v7x (harmless on 1-TC chips).
    n_split = 2 if nrb >= 2 else 1
    half = pl.cdiv(nrb, n_split)

    need_row_mask = (rows % bn != 0) or (half * n_split != nrb)
    need_col_mask = (cols % bd != 0)

    # Runtime scalars live in SMEM -> changing them does not trigger a recompile.
    params = jnp.stack([jnp.float32(weight), jnp.float32(1.0 / n), wd_term])

    kernel = _make_kernel(rows, cols, bn, bd, half, need_row_mask, need_col_mask)

    # Clamp the logical row-block index (an over-split trailing block re-reads a
    # valid block and is fully masked in-kernel).
    data_spec = pl.BlockSpec(
        (bn, bd), lambda c, i, j: (jnp.minimum(c * half + i, nrb - 1), j))

    partials = pl.pallas_call(
        kernel,
        out_shape=jax.ShapeDtypeStruct((n_split, 1), jnp.float32),
        grid=(n_split, half, ncb),
        in_specs=[
            pl.BlockSpec(memory_space=pltpu.SMEM),   # params (3,)
            data_spec,                               # output tiles (native dtype)
            data_spec,                               # target tiles (native dtype)
        ],
        out_specs=pl.BlockSpec((1, 1), lambda c, i, j: (c, 0),
                               memory_space=pltpu.SMEM),
        compiler_params=pltpu.CompilerParams(
            dimension_semantics=("parallel", "arbitrary", "arbitrary"),
            vmem_limit_bytes=min(vmem_cap * 3 // 4, 112 * 1024 * 1024),
        ),
    )(params, x, y)
    return jnp.sum(partials)


def weighted_xor_loss_ref(output, target, w, *, weight, weight_decay):
    d = target.shape[1]
    pos = jnp.maximum(output - target, 0.0).sum(axis=1)
    neg = jnp.maximum(target - output, 0.0).sum(axis=1)
    term1 = jnp.mean(pos * weight) + jnp.mean(neg * (1.0 - weight))
    row = jnp.maximum((w - 1.0 / d).sum(axis=1), 1.0)
    return term1 + weight_decay * jnp.sum(row * row)


if __name__ == "__main__":
    weight = 0.7          # class weight (scalar), as in weightedXor.__init__
    weight_decay = 0.01   # weight decay (scalar)

    def check(loss, ref, tol=2e-4):
        assert np.allclose(np.asarray(loss), np.asarray(ref), rtol=tol, atol=tol), (loss, ref)

    # Case 1: small BinAPS-like shapes, D < 128 -> lane-dense flatten path,
    # bf16 streaming with in-kernel upcast.
    k1, k2, k3 = jax.random.split(jax.random.PRNGKey(0), 3)
    N, D, H = 8, 32, 16
    out1 = jax.random.uniform(k1, (N, D), dtype=jnp.float32).astype(jnp.bfloat16)
    tgt1 = (jax.random.uniform(k2, (N, D)) > 0.5).astype(jnp.bfloat16)
    w1 = jax.random.uniform(k3, (H, D), dtype=jnp.float32)
    loss1 = jax.block_until_ready(
        weighted_xor_loss(out1, tgt1, w1, weight=weight, weight_decay=weight_decay))
    ref1 = weighted_xor_loss_ref(out1.astype(jnp.float32), tgt1.astype(jnp.float32), w1,
                                 weight=weight, weight_decay=weight_decay)
    check(loss1, ref1)

    # Case 2: N not a multiple of the forced row block -> multi-step scalar
    # accumulation, 2-way core split with a clamped fully-masked trailing block,
    # and an in-kernel row tail mask (no jnp.pad anywhere).
    k4, k5, k6 = jax.random.split(jax.random.PRNGKey(1), 3)
    N2, D2, H2 = 20, 256, 16
    out2 = jax.random.uniform(k4, (N2, D2), dtype=jnp.float32)
    tgt2 = (jax.random.uniform(k5, (N2, D2)) > 0.5).astype(jnp.float32)
    w2 = jax.random.uniform(k6, (H2, D2), dtype=jnp.float32)
    loss2 = jax.block_until_ready(
        weighted_xor_loss(out2, tgt2, w2, weight=weight, weight_decay=weight_decay,
                          block_n=8))
    ref2 = weighted_xor_loss_ref(out2, tgt2, w2, weight=weight, weight_decay=weight_decay)
    check(loss2, ref2)

    # Case 3: feature axis tiled (2-D reduction grid) with a partial lane block.
    k7, k8, k9 = jax.random.split(jax.random.PRNGKey(2), 3)
    N3, D3, H3 = 16, 300, 8
    out3 = jax.random.uniform(k7, (N3, D3), dtype=jnp.float32)
    tgt3 = (jax.random.uniform(k8, (N3, D3)) > 0.5).astype(jnp.float32)
    w3 = jax.random.uniform(k9, (H3, D3), dtype=jnp.float32)
    loss3 = jax.block_until_ready(
        weighted_xor_loss(out3, tgt3, w3, weight=weight, weight_decay=weight_decay,
                          block_n=16, block_d=128))
    ref3 = weighted_xor_loss_ref(out3, tgt3, w3, weight=weight, weight_decay=weight_decay)
    check(loss3, ref3)

    print("KERNEL_OK")
</pallas_src>

<mosaic_0001>
module attributes {stable_mosaic.version = 11 : i64} {
  func.func @kernel(%arg0: i32, %arg1: i32, %arg2: i32, %arg3: memref<3xf32, #tpu.memory_space<smem>>, %arg4: memref<1x256xbf16, #tpu.memory_space<vmem>>, %arg5: memref<1x256xbf16, #tpu.memory_space<vmem>>, %arg6: memref<1x1xf32, #tpu.memory_space<smem>>) attributes {dimension_semantics = [#tpu.dimension_semantics<parallel>, #tpu.dimension_semantics<arbitrary>, #tpu.dimension_semantics<arbitrary>], iteration_bounds = array<i64: 1, 1, 1>, scalar_prefetch = 0 : i64, scratch_operands = 0 : i64, tpu.core_type = #tpu.core_type<tc>, window_params = [{transform_indices = @transform_0, window_bounds = array<i64: 3>}, {transform_indices = @transform_1, window_bounds = array<i64: 1, 256>}, {transform_indices = @transform_2, window_bounds = array<i64: 1, 256>}, {transform_indices = @transform_3, window_bounds = array<i64: 1, 1>}]} {
    %c0 = arith.constant 0 : index
    %0 = memref.load %arg3[%c0] : memref<3xf32, #tpu.memory_space<smem>>
    %c1 = arith.constant 1 : index
    %1 = memref.load %arg3[%c1] : memref<3xf32, #tpu.memory_space<smem>>
    %c2 = arith.constant 2 : index
    %2 = memref.load %arg3[%c2] : memref<3xf32, #tpu.memory_space<smem>>
    %c0_i32 = arith.constant 0 : i32
    %3 = arith.cmpi eq, %arg1, %c0_i32 : i32
    %c0_i32_0 = arith.constant 0 : i32
    %4 = arith.cmpi eq, %arg2, %c0_i32_0 : i32
    %5 = arith.andi %3, %4 : i1
    %6 = arith.extui %5 : i1 to i32
    %c0_i32_1 = arith.constant 0 : i32
    %7 = arith.cmpi ne, %6, %c0_i32_1 : i32
    scf.if %7 {
      %c0_i32_12 = arith.constant 0 : i32
      %27 = arith.cmpi eq, %arg0, %c0_i32_12 : i32
      %cst_13 = arith.constant 0.000000e+00 : f32
      %28 = arith.select %27, %2, %cst_13 : f32
      %c0_14 = arith.constant 0 : index
      %c0_15 = arith.constant 0 : index
      %29 = memref.load %arg6[%c0_14, %c0_15] : memref<1x1xf32, #tpu.memory_space<smem>>
      memref.store %28, %arg6[%c0_14, %c0_15] : memref<1x1xf32, #tpu.memory_space<smem>>
    } else {
    }
    %c0_2 = arith.constant 0 : index
    %c0_3 = arith.constant 0 : index
    %8 = vector.load %arg4[%c0_2, %c0_3] : memref<1x256xbf16, #tpu.memory_space<vmem>>, vector<1x256xbf16>
    %9 = arith.extf %8 : vector<1x256xbf16> to vector<1x256xf32>
    %c0_4 = arith.constant 0 : index
    %c0_5 = arith.constant 0 : index
    %10 = vector.load %arg5[%c0_4, %c0_5] : memref<1x256xbf16, #tpu.memory_space<vmem>>, vector<1x256xbf16>
    %11 = arith.extf %10 : vector<1x256xbf16> to vector<1x256xf32>
    %12 = arith.subf %9, %11 : vector<1x256xf32>
    %cst = arith.constant 0.000000e+00 : f32
    %13 = vector.broadcast %cst : f32 to vector<1x256xf32>
    %14 = arith.maximumf %12, %13 : vector<1x256xf32>
    %cst_6 = arith.constant 1.000000e+00 : f32
    %15 = arith.subf %cst_6, %0 : f32
    %16 = vector.broadcast %15 : f32 to vector<1x256xf32>
    %17 = arith.mulf %16, %12 : vector<1x256xf32>
    %18 = arith.subf %14, %17 : vector<1x256xf32>
    %c0_7 = arith.constant 0 : index
    %c0_8 = arith.constant 0 : index
    %19 = memref.load %arg6[%c0_7, %c0_8] : memref<1x1xf32, #tpu.memory_space<smem>>
    %20 = vector.shape_cast %18 : vector<1x256xf32> to vector<1x1x256xf32>
    %cst_9 = arith.constant dense<0.000000e+00> : vector<1xf32>
    %21 = vector.multi_reduction <add>, %20, %cst_9 [1, 2] : vector<1x1x256xf32> to vector<1xf32>
    %22 = vector.shape_cast %21 : vector<1xf32> to vector<1x1x1xf32>
    %23 = vector.extract %22[0, 0, 0] : f32 from vector<1x1x1xf32>
    %24 = arith.mulf %1, %23 : f32
    %25 = arith.addf %19, %24 : f32
    %c0_10 = arith.constant 0 : index
    %c0_11 = arith.constant 0 : index
    %26 = memref.load %arg6[%c0_10, %c0_11] : memref<1x1xf32, #tpu.memory_space<smem>>
    memref.store %25, %arg6[%c0_10, %c0_11] : memref<1x1xf32, #tpu.memory_space<smem>>
    return
  }
  func.func @transform_0(%arg0: i32, %arg1: i32, %arg2: i32) -> i32 {
    %c0_i32 = arith.constant 0 : i32
    %c0_i32_0 = arith.constant 0 : i32
    return %c0_i32 : i32
  }
  func.func @transform_1(%arg0: i32, %arg1: i32, %arg2: i32) -> (i32, i32) {
    %c1_i32 = arith.constant 1 : i32
    %0 = arith.muli %arg0, %c1_i32 : i32
    %1 = arith.addi %0, %arg1 : i32
    %c0_i32 = arith.constant 0 : i32
    %2 = arith.minsi %1, %c0_i32 : i32
    %c0_i32_0 = arith.constant 0 : i32
    return %2, %arg2 : i32, i32
  }
  func.func @transform_2(%arg0: i32, %arg1: i32, %arg2: i32) -> (i32, i32) {
    %c1_i32 = arith.constant 1 : i32
    %0 = arith.muli %arg0, %c1_i32 : i32
    %1 = arith.addi %0, %arg1 : i32
    %c0_i32 = arith.constant 0 : i32
    %2 = arith.minsi %1, %c0_i32 : i32
    %c0_i32_0 = arith.constant 0 : i32
    return %2, %arg2 : i32, i32
  }
  func.func @transform_3(%arg0: i32, %arg1: i32, %arg2: i32) -> (i32, i32) {
    %c0_i32 = arith.constant 0 : i32
    %c0_i32_0 = arith.constant 0 : i32
    return %arg0, %c0_i32 : i32, i32
  }
}

</mosaic_0001>

<bundles_post_ra>
// kernel: tpu_custom_call.1
= control target key start
LH: loop header
LB: loop body
LE: loop exit
PB: predicated region body
PF: predicated region fallthrough
CT: control target
= control target key end

     0   :  { %8 = vsyncpa [#allocation4], 0  ;;  %s264_s0 = inlined_call_operand.hbm [shape: f32[3], index: 0, kind: input, shape index: {}]   ;;  %s265_s1 = inlined_call_operand.hbm [shape: bf16[1,256], index: 1, kind: input, shape index: {}]   ;;  %s266_s2 = inlined_call_operand.hbm [shape: bf16[1,256], index: 2, kind: input, shape index: {}]   ;;  %s267_s3 = inlined_call_operand.hbm [shape: f32[1,1], index: 3, kind: output, shape index: {}]  }
   0x1   :  { %9 = vsyncpa [#allocation3], 0 }
   0x2   :  { %10 = vsyncpa [#allocation8], 0 }
   0x3   :  { %11 = vsyncpa [#allocation5], 0  ;;  %s17_s14 = sshll.u32 %s264_s0, 4  ;;  %s31_s17 = sshll.u32 %s265_s1, 4  ;;  %s18_s14 = int_to_ptr.hbm [resolvable:$true] %s17_s14  ;;  %s32_s17 = int_to_ptr.hbm [resolvable:$true] %s31_s17 }
   0x4   :  { %s228_s18 = smov [#allocation2]   ;;  %s229_s19 = smov [#allocation6]  }
   0x5   :  { %20 = dma.hbm_to_smem %s18_s14, 16, %s228_s18, [#allocation4]  }
   0x6   :  { %s33_s20 = sshll.u32 %s229_s19, 4  ;;  %s47_s23 = sshll.u32 %s266_s2, 4  ;;  %s34_s20 = int_to_ptr.vmem [resolvable:$true] %s33_s20  ;;  %s48_s23 = int_to_ptr.hbm [resolvable:$true] %s47_s23 }
   0x7   :  { %36 = dma.hbm_to_vmem [thread:$0]  %s32_s17, 32, %s34_s20, [#allocation3]  }
   0x8   :  { %s230_s24 = smov [#allocation7]  }
   0x9   :  { %s49_s25 = sshll.u32 %s230_s24, 4  ;;  %s50_s25 = int_to_ptr.vmem [resolvable:$true] %s49_s25 }
   0xa   :  { %52 = dma.hbm_to_vmem [thread:$0]  %s48_s23, 32, %s50_s25, [#allocation8]  }
   0xb   :  { %220 = dma.done.wait [#allocation4], 16  }
   0xc   :  { %221 = vsyncadd [#allocation4], 4294967280 }
   0xd   :  { %222 = dma.done.wait [#allocation3], 32  }
   0xe   :  { %223 = vsyncadd [#allocation3], 4294967264 }
   0xf   :  { %224 = dma.done.wait [#allocation8], 32  }
  0x10   :  { %225 = vsyncadd [#allocation8], 4294967264 }
  0x11   :  { %65 = sfence }
  0x12   :  { %s72_s0 = sld [smem:[#allocation2]]  ;;  %v85_v0 = vld [vmem:[#allocation6] sm:$0x3]  ;;  %v87_v1 = vld [vmem:[#allocation7] sm:$0x3]  ;;  %vm101_vm0 = vcmask 1040384  }
  0x13   :  { %v86_v2 = vunpack.c.l.bf16 %v85_v0  ;;  %v88_v3 = vunpack.c.l.bf16 %v87_v1  ;;  %s140_s2 = sld [smem:[#allocation2 + $0x1]]  ;;  %s123_s29 = sshll.u32 %s267_s3, 4  ;;  %s124_s29 = int_to_ptr.hbm [resolvable:$true] %s123_s29 }
  0x14   :  { %s141_s26 = sld [smem:[#allocation2 + $0x2]]  ;;  %s231_s6 = smov [#allocation9]  }
  0x15   :  { %v89_v4 = vsub.f32 %v86_v2, %v88_v3 }
  0x17   :  { %v90_v5 = vmax.f32 %v89_v4, 0.0 }
  0x18   :  { %s91_s1 = ssub.f32 1.0, %s72_s0 }
  0x1a   :  { %v92_v6 = vstv %s91_s1 }
  0x1b   :  { %v93_v7 = vmul.f32 %v92_v6, %v89_v4 }
  0x1d   :  { %v94_v8 = vsub.f32 %v90_v5, %v93_v7 }
  0x1f   :  { %v97_v9 = vperm.slane %v94_v8, 0  ;;  %v98_v10 = vperm.slane %v94_v8, 2 }
  0x21   :  { %v102_v11 = vsel %vm101_vm0, %v97_v9, 0.0  ;;  %v103_v12 = vsel %vm101_vm0, %v98_v10, 0.0 }
  0x22   :  { %v104_v13 = vadd.f32 %v103_v12, %v102_v11 }
  0x24   :  { %105 = vadd.xlane.f32.xlu0 %v104_v13 }
  0x97   :  { %v106_v14 = vpop.xlane.xlu0 %105 }
  0x98   :  { %v107_v15 = vrot.slane %v106_v14, 4 }
  0x9a   :  { %v108_v16 = vadd.f32 %v107_v15, %v106_v14 }
  0x9c   :  { %v109_v17 = vrot.slane %v108_v16, 2 }
  0x9e   :  { %v110_v18 = vadd.f32 %v109_v17, %v108_v16 }
  0xa0   :  { %v111_v19 = vrot.slane %v110_v18, 1 }
  0xa2   :  { %v112_v20 = vadd.f32 %v111_v19, %v110_v18 }
  0xa4   :  { %142 = vpush %v112_v20 }
  0xd5   :  { %s143_s30 = spop %142 }
  0xd6   :  { %s114_s4 = smul.f32 %s143_s30, %s140_s2 }
  0xd8   :  { %s115_s5 = sadd.f32 %s141_s26, %s114_s4 }
  0xda   :  { %117 = sst [smem:[#allocation9]] %s115_s5 }
  0xdb   :  { %126 = dma.smem_to_hbm %s231_s6, 16, %s124_s29, [#allocation5]  }
  0xdc   :  { %226 = dma.done.wait [#allocation5], 16  }
  0xdd   :  { %227 = vsyncadd [#allocation5], 4294967280 }
  0xde   :  { %131 = sfence }
  0xdf   :  { %132 = vsyncpa [#allocation3], 1 }
  0xe0   :  { %133 = vsyncpa [#allocation8], 1 }
  0xe1   :  { %134 = vsyncpa [#allocation4], 1 }
  0xe2   :  { %135 = vsyncpa [#allocation5], 1 }

</bundles_post_ra>
